<compile_context>
chip_gen: v6e
topology: v6e:2x2x1
jax: 0.10.0
libtpu: 0.0.40
codegen_flags: <defaults>
</compile_context>

<pallas_src>
import functools

import jax
import jax.numpy as jnp
import numpy as np
from jax.experimental import pallas as pl
from jax.experimental.pallas import tpu as pltpu

EPS_BN = 1e-5
EPS_NORM = 1e-12
VMEM_LIMIT = 48 * 1024 * 1024   # > 16/32 MiB defaults, < 64/128 MiB physical


# ----------------------------------------------------------------------------
# Kernel 1: NeXtVLAD aggregation, gridded over batch (one video per grid step).
# ----------------------------------------------------------------------------
def nextvlad_kernel(x_ref, w_exp_ref, b_exp_ref, w_g_ref, b_g_ref,
                    w_c_ref, b_c_ref, s0_ref, t0_ref, cw2_ref,
                    out_ref, *, G, K, gs):
    # Expansion FC on the MXU in bf16 (f32 accumulation).
    x = x_ref[0].astype(jnp.bfloat16)                                     # (M, N)
    xe = jnp.dot(x, w_exp_ref[...],
                 preferred_element_type=jnp.float32) + b_exp_ref[...]     # (M, L) f32
    xe_bf = xe.astype(jnp.bfloat16)

    # Per-group attention (sigmoid kept in f32).
    # TODO(synk): mask=None path only (the optional frame mask is not modeled).
    attn = jax.nn.sigmoid(
        jnp.dot(xe_bf, w_g_ref[...],
                preferred_element_type=jnp.float32) + b_g_ref[...])       # (M, G)

    s0 = s0_ref[...]                                                      # (M, 1)
    t0 = t0_ref[...]                                                      # (M, 1)

    vlad = jnp.zeros((gs, K), jnp.float32)
    a_sum = jnp.zeros((1, K), jnp.float32)
    # Static unroll over groups (G is small). Every operand stays a natural
    # (M, *) tile: no (M, G*K) -> (M*G, K) relayout, no in-kernel flatten.
    for g in range(G):
        # soft cluster assignment for this group: (M, L) @ (L, K)
        act = jnp.dot(xe_bf, w_c_ref[g],
                      preferred_element_type=jnp.float32) + b_c_ref[g]    # (M, K)
        act = act * s0 + t0              # folded frame-wise BatchNorm (inference)
        # softmax over the K clusters; reciprocal on the EUP.
        act = act - jnp.max(act, axis=-1, keepdims=True)
        p = jnp.exp(act)
        p = p * pl.reciprocal(jnp.sum(p, axis=-1, keepdims=True), approx=True)
        p = p * attn[:, g:g + 1]                                          # attention
        a_sum = a_sum + jnp.sum(p, axis=0, keepdims=True)                 # (1, K)
        # vlad += xe_g^T @ p    (both operands (M, *); lowers cleanly)
        xe_g = xe[:, g * gs:(g + 1) * gs].astype(jnp.bfloat16)            # (M, gs)
        vlad = vlad + jax.lax.dot_general(
            xe_g, p.astype(jnp.bfloat16), (((0,), (0,)), ((), ())),
            preferred_element_type=jnp.float32)                           # (gs, K)

    vlad = vlad - a_sum * cw2_ref[...]
    # F.normalize(vlad, p=2, dim=1): L2 over group_size axis; f32 sum + rsqrt.
    nsq = jnp.sum(vlad * vlad, axis=0, keepdims=True)
    vlad = vlad * jax.lax.rsqrt(jnp.maximum(nsq, EPS_NORM * EPS_NORM))
    out_ref[0] = vlad       # (gs, K); flattened outside (metadata-only reshape)


# ----------------------------------------------------------------------------
# Kernel 2: classifier head with SE-style context gating, tiled over (B, D0).
# The D0 axis is a streamed reduction (w0 blocks DMA'd tile by tile).
# ----------------------------------------------------------------------------
def head_kernel(v_ref, w0_ref, b0_ref, w1_ref, b1_ref, w2_ref, b2_ref,
                wl_ref, bl_ref, out_ref, acc_ref):
    k = pl.program_id(1)

    @pl.when(k == 0)
    def _():
        acc_ref[...] = jnp.zeros_like(acc_ref)

    # Streaming reduction over D0: (tb, tk) @ (tk, H) in bf16, f32 accumulator.
    acc_ref[...] += jnp.dot(v_ref[...].astype(jnp.bfloat16), w0_ref[...],
                            preferred_element_type=jnp.float32)

    @pl.when(k == pl.num_programs(1) - 1)
    def _():
        # TODO(synk): F.dropout on vlad is stochastic in training; identity here
        # (inference). Descriptor BN and the BatchNorm1d(1) after fc0/fc1 are
        # pre-folded into w0/b0 and w1/b1 on the host.
        act = jnp.maximum(acc_ref[...] + b0_ref[...], 0.0)                # (tb, H)
        act_bf = act.astype(jnp.bfloat16)
        gates = jnp.dot(act_bf, w1_ref[...],
                        preferred_element_type=jnp.float32) + b1_ref[...]
        gates = jnp.dot(gates.astype(jnp.bfloat16), w2_ref[...],
                        preferred_element_type=jnp.float32) + b2_ref[...]
        gates = jax.nn.sigmoid(gates)
        out = jnp.dot((act * gates).astype(jnp.bfloat16), wl_ref[...],
                      preferred_element_type=jnp.float32) + bl_ref[...]
        out_ref[...] = jax.nn.sigmoid(out)


# ----------------------------------------------------------------------------
# Wrapper
# ----------------------------------------------------------------------------
def nextvlad_model_forward(x, p, *, lamb, groups, num_clusters, head_tk=None):
    B, M, N = x.shape
    L = lamb * N
    G, K = groups, num_clusters
    gs = L // G
    D0 = gs * K

    full = lambda shape: pl.BlockSpec(shape, lambda b: (0,) * len(shape))

    vlad3 = pl.pallas_call(
        functools.partial(nextvlad_kernel, G=G, K=K, gs=gs),
        out_shape=jax.ShapeDtypeStruct((B, gs, K), jnp.float32),
        grid_spec=pltpu.PrefetchScalarGridSpec(
            num_scalar_prefetch=0,
            grid=(B,),
            in_specs=[
                pl.BlockSpec((1, M, N), lambda b: (b, 0, 0)),   # x
                full((N, L)), full((1, L)),                     # expansion fc (bf16 W)
                full((L, G)), full((1, G)),                     # group attention fc
                full((G, L, K)), full((G, 1, K)),               # cluster fc, per-group
                full((M, 1)), full((M, 1)),                     # folded frame BN
                full((gs, K)),                                  # cluster_weights2
            ],
            out_specs=pl.BlockSpec((1, gs, K), lambda b: (b, 0, 0)),
        ),
        compiler_params=pltpu.CompilerParams(
            dimension_semantics=("parallel",),
            vmem_limit_bytes=VMEM_LIMIT),
    )(x, p["w_exp"], p["b_exp"], p["w_g"], p["b_g"], p["w_c"], p["b_c"],
      p["bn0_scale"], p["bn0_shift"], p["cw2"])

    vlad = vlad3.reshape(B, D0)     # contiguous: metadata-only reshape in XLA

    H = p["w0"].shape[1]
    Hr = p["w1"].shape[1]
    C = p["wl"].shape[1]

    if head_tk is None:
        head_tk = D0
        if D0 % 128 == 0:
            # Largest 128-multiple dividing D0, capped at 2048: a (2048, H) bf16
            # w0 block double-buffered stays well inside every generation's VMEM.
            for cand in range(128, min(D0, 2048) + 1, 128):
                if D0 % cand == 0:
                    head_tk = cand
    tb = B
    assert D0 % head_tk == 0 and B % tb == 0
    nb, nk = B // tb, D0 // head_tk

    out = pl.pallas_call(
        head_kernel,
        out_shape=jax.ShapeDtypeStruct((B, C), jnp.float32),
        grid_spec=pltpu.PrefetchScalarGridSpec(
            num_scalar_prefetch=0,
            grid=(nb, nk),
            in_specs=[
                pl.BlockSpec((tb, head_tk), lambda b, k: (b, k)),   # vlad tile
                pl.BlockSpec((head_tk, H), lambda b, k: (k, 0)),    # w0 tile (bf16)
                pl.BlockSpec((1, H), lambda b, k: (0, 0)),          # b0 (BN-folded)
                pl.BlockSpec((H, Hr), lambda b, k: (0, 0)),         # w1 (BN-folded)
                pl.BlockSpec((1, Hr), lambda b, k: (0, 0)),         # b1
                pl.BlockSpec((Hr, H), lambda b, k: (0, 0)),         # w2
                pl.BlockSpec((1, H), lambda b, k: (0, 0)),          # b2
                pl.BlockSpec((H, C), lambda b, k: (0, 0)),          # logistic W
                pl.BlockSpec((1, C), lambda b, k: (0, 0)),          # logistic b
            ],
            out_specs=pl.BlockSpec((tb, C), lambda b, k: (b, 0)),
            scratch_shapes=[pltpu.VMEM((tb, H), jnp.float32)],
        ),
        compiler_params=pltpu.CompilerParams(
            dimension_semantics=("parallel", "arbitrary"),
            vmem_limit_bytes=VMEM_LIMIT),
    )(vlad, p["w0"], p["b0"], p["w1"], p["b1"], p["w2"], p["b2"],
      p["wl"], p["bl"])
    return out


# ----------------------------------------------------------------------------
# Host-side parameter preparation (BN folding, bf16 weights, 2-D biases,
# per-group cluster weights).
# ----------------------------------------------------------------------------
def prepare_params(raw, *, lamb, groups, num_clusters):
    G, K = groups, num_clusters
    N, L = raw["w_exp"].shape
    gs = L // G
    H = raw["w0"].shape[1]
    Hr = raw["w1"].shape[1]
    C = raw["wl"].shape[1]
    bf16, f32 = jnp.bfloat16, jnp.float32

    def fold(bn):                                  # bn = [gamma, beta, mean, var]
        s = bn[0] * jax.lax.rsqrt(bn[3] + EPS_BN)
        return s, bn[1] - bn[2] * s

    # Frame-wise BN inside NeXtVLAD -> one (M, 1) scale / shift FMA.
    s0 = raw["bn0_g"] * jax.lax.rsqrt(raw["bn0_v"] + EPS_BN)
    t0 = raw["bn0_b"] - raw["bn0_m"] * s0

    # Descriptor BN (NeXtVLAD) + BatchNorm1d(1) after fc0 -> fold into fc0.
    sd, td = fold(raw["bn1"])
    sa, ta = fold(raw["bnA"])
    w0f = (sa * sd) * raw["w0"]
    b0f = sa * (td * jnp.sum(raw["w0"], axis=0) + raw["b0"]) + ta
    # BatchNorm1d(1) after fc1 -> fold into fc1.
    sb, tbs = fold(raw["bnB"])
    w1f = sb * raw["w1"]
    b1f = sb * raw["b1"] + tbs

    return dict(
        w_exp=raw["w_exp"].astype(bf16),
        b_exp=raw["b_exp"].reshape(1, L).astype(f32),
        w_g=raw["w_g"].astype(bf16),
        b_g=raw["b_g"].reshape(1, G).astype(f32),
        w_c=jnp.transpose(raw["w_c"].reshape(L, G, K), (1, 0, 2)).astype(bf16),
        b_c=raw["b_c"].reshape(G, 1, K).astype(f32),
        bn0_scale=s0.reshape(-1, 1).astype(f32),
        bn0_shift=t0.reshape(-1, 1).astype(f32),
        cw2=raw["cw2"].reshape(gs, K).astype(f32),
        w0=w0f.astype(bf16), b0=b0f.reshape(1, H).astype(f32),
        w1=w1f.astype(bf16), b1=b1f.reshape(1, Hr).astype(f32),
        w2=raw["w2"].astype(bf16), b2=raw["b2"].reshape(1, H).astype(f32),
        wl=raw["wl"].astype(bf16), bl=raw["bl"].reshape(1, C).astype(f32),
    )


# ----------------------------------------------------------------------------
# Pure-JAX f32 reference (un-folded, same math) for validation
# ----------------------------------------------------------------------------
def reference_forward(x, p, *, lamb, groups, num_clusters):
    B, M, N = x.shape
    G, K = groups, num_clusters
    gs = (lamb * N) // G

    def bn(v, b4):
        return (v - b4[2]) / jnp.sqrt(b4[3] + EPS_BN) * b4[0] + b4[1]

    xe = x @ p["w_exp"] + p["b_exp"]
    attn = jax.nn.sigmoid(xe @ p["w_g"] + p["b_g"]).reshape(B, M * G, 1)
    act = xe @ p["w_c"] + p["b_c"]
    act = (act - p["bn0_m"][None, :, None]) \
          / jnp.sqrt(p["bn0_v"][None, :, None] + EPS_BN) \
          * p["bn0_g"][None, :, None] + p["bn0_b"][None, :, None]
    act = jax.nn.softmax(act.reshape(B, M * G, K), axis=-1) * attn
    a = jnp.sum(act, axis=1, keepdims=True) * p["cw2"]
    rx = xe.reshape(B, M * G, gs)
    vlad = jnp.einsum("bmk,bmg->bgk", act, rx) - a
    vlad = vlad / jnp.maximum(jnp.linalg.norm(vlad, axis=1, keepdims=True), EPS_NORM)
    v = bn(vlad.reshape(B, gs * K), p["bn1"])
    a0 = jnp.maximum(bn(v @ p["w0"] + p["b0"], p["bnA"]), 0.0)
    g = bn(a0 @ p["w1"] + p["b1"], p["bnB"])
    g = jax.nn.sigmoid(g @ p["w2"] + p["b2"])
    return jax.nn.sigmoid((a0 * g) @ p["wl"] + p["bl"])


def init_params(key, *, N, M, lamb, groups, num_clusters, hidden,
                gating_reduction, num_classes):
    L = lamb * N
    G, K = groups, num_clusters
    gs = L // G
    D0 = K * gs
    Hr = hidden // gating_reduction
    ks = jax.random.split(key, 24)
    rnd = lambda k, shp, s=0.05: (s * jax.random.normal(k, shp)).astype(jnp.float32)

    def bn4(k):                                    # [gamma, beta, mean, var]
        k1, k2, k3, k4 = jax.random.split(k, 4)
        return jnp.stack([
            1.0 + 0.1 * jax.random.normal(k1, ()),
            0.05 * jax.random.normal(k2, ()),
            0.1 * jax.random.normal(k3, ()),
            0.5 + jax.random.uniform(k4, ()),
        ]).astype(jnp.float32)

    return dict(
        # NeXtVLAD
        w_exp=rnd(ks[0], (N, L)), b_exp=rnd(ks[1], (L,)),
        w_g=rnd(ks[2], (L, G)), b_g=rnd(ks[3], (G,)),
        w_c=rnd(ks[4], (L, G * K)), b_c=rnd(ks[5], (G * K,)),
        bn0_g=(1.0 + 0.1 * jax.random.normal(ks[6], (M,))).astype(jnp.float32),
        bn0_b=rnd(ks[7], (M,)),
        bn0_m=rnd(ks[8], (M,), 0.1),
        bn0_v=(0.5 + jax.random.uniform(ks[9], (M,))).astype(jnp.float32),
        cw2=jax.random.uniform(ks[10], (1, gs, K)).astype(jnp.float32),
        bn1=bn4(ks[11]),
        # classifier head
        w0=rnd(ks[12], (D0, hidden)), b0=rnd(ks[13], (hidden,)),
        bnA=bn4(ks[14]),
        w1=rnd(ks[15], (hidden, Hr)), b1=rnd(ks[16], (Hr,)),
        bnB=bn4(ks[17]),
        w2=rnd(ks[18], (Hr, hidden)), b2=rnd(ks[19], (hidden,)),
        wl=rnd(ks[20], (hidden, num_classes)), bl=rnd(ks[21], (num_classes,)),
    )


if __name__ == "__main__":
    # Small, self-consistent configuration (dim=32 instead of 1024, etc.)
    B, M, N = 2, 8, 32                     # batch, frames, feature dim
    lamb, groups, num_clusters = 2, 4, 16  # -> group_size=16, D0=256
    hidden, gating_reduction, num_classes = 32, 8, 5

    key = jax.random.PRNGKey(0)
    kx, kp = jax.random.split(key)
    x = jax.random.normal(kx, (B, M, N), dtype=jnp.float32)
    raw = init_params(kp, N=N, M=M, lamb=lamb, groups=groups,
                      num_clusters=num_clusters, hidden=hidden,
                      gating_reduction=gating_reduction, num_classes=num_classes)
    params = prepare_params(raw, lamb=lamb, groups=groups,
                            num_clusters=num_clusters)

    # head_tk=128 forces a 2-step D0 reduction to exercise the accumulator path
    # even at these small shapes.
    out = nextvlad_model_forward(x, params, lamb=lamb, groups=groups,
                                 num_clusters=num_clusters, head_tk=128)
    out = jax.block_until_ready(out)

    ref = reference_forward(x, raw, lamb=lamb, groups=groups,
                            num_clusters=num_clusters)
    # Tolerance reflects bf16 matmul operands + approx reciprocal in the kernel.
    np.testing.assert_allclose(np.asarray(out), np.asarray(ref),
                               rtol=2e-2, atol=2e-2)

    assert out.shape == (B, num_classes)
    print("KERNEL_OK")
</pallas_src>

<mosaic_0001>
module attributes {stable_mosaic.version = 11 : i64} {
  func.func @nextvlad_kernel(%arg0: i32, %arg1: memref<1x8x32xf32, #tpu.memory_space<vmem>>, %arg2: memref<32x64xbf16, #tpu.memory_space<vmem>>, %arg3: memref<1x64xf32, #tpu.memory_space<vmem>>, %arg4: memref<64x4xbf16, #tpu.memory_space<vmem>>, %arg5: memref<1x4xf32, #tpu.memory_space<vmem>>, %arg6: memref<4x64x16xbf16, #tpu.memory_space<vmem>>, %arg7: memref<4x1x16xf32, #tpu.memory_space<vmem>>, %arg8: memref<8x1xf32, #tpu.memory_space<vmem>>, %arg9: memref<8x1xf32, #tpu.memory_space<vmem>>, %arg10: memref<16x16xf32, #tpu.memory_space<vmem>>, %arg11: memref<1x16x16xf32, #tpu.memory_space<vmem>>) attributes {dimension_semantics = [#tpu.dimension_semantics<parallel>], iteration_bounds = array<i64: 2>, scalar_prefetch = 0 : i64, scratch_operands = 0 : i64, tpu.core_type = #tpu.core_type<tc>, window_params = [{transform_indices = @transform_0, window_bounds = array<i64: 1, 8, 32>}, {pipeline_mode = #tpu.pipeline_mode<synchronous>, transform_indices = @transform_1, window_bounds = array<i64: 32, 64>}, {pipeline_mode = #tpu.pipeline_mode<synchronous>, transform_indices = @transform_2, window_bounds = array<i64: 1, 64>}, {pipeline_mode = #tpu.pipeline_mode<synchronous>, transform_indices = @transform_3, window_bounds = array<i64: 64, 4>}, {pipeline_mode = #tpu.pipeline_mode<synchronous>, transform_indices = @transform_4, window_bounds = array<i64: 1, 4>}, {pipeline_mode = #tpu.pipeline_mode<synchronous>, transform_indices = @transform_5, window_bounds = array<i64: 4, 64, 16>}, {pipeline_mode = #tpu.pipeline_mode<synchronous>, transform_indices = @transform_6, window_bounds = array<i64: 4, 1, 16>}, {pipeline_mode = #tpu.pipeline_mode<synchronous>, transform_indices = @transform_7, window_bounds = array<i64: 8, 1>}, {pipeline_mode = #tpu.pipeline_mode<synchronous>, transform_indices = @transform_8, window_bounds = array<i64: 8, 1>}, {pipeline_mode = #tpu.pipeline_mode<synchronous>, transform_indices = @transform_9, window_bounds = array<i64: 16, 16>}, {transform_indices = @transform_10, window_bounds = array<i64: 1, 16, 16>}]} {
    %c0 = arith.constant 0 : index
    %c0_0 = arith.constant 0 : index
    %c0_1 = arith.constant 0 : index
    %0 = vector.load %arg1[%c0, %c0_0, %c0_1] : memref<1x8x32xf32, #tpu.memory_space<vmem>>, vector<1x8x32xf32>
    %1 = vector.shape_cast %0 : vector<1x8x32xf32> to vector<8x32xf32>
    %2 = arith.truncf %1 : vector<8x32xf32> to vector<8x32xbf16>
    %c0_2 = arith.constant 0 : index
    %c0_3 = arith.constant 0 : index
    %3 = vector.load %arg2[%c0_2, %c0_3] : memref<32x64xbf16, #tpu.memory_space<vmem>>, vector<32x64xbf16>
    %cst = arith.constant dense<0.000000e+00> : vector<8x64xf32>
    %4 = tpu.matmul %2, %3, %cst {dimension_numbers = #tpu.dot_dimension_numbers<[1], [0], [0], [1], [0, 0, 1, 1], [], []>} : vector<8x32xbf16>, vector<32x64xbf16>, vector<8x64xf32> -> vector<8x64xf32>
    %c0_4 = arith.constant 0 : index
    %c0_5 = arith.constant 0 : index
    %5 = vector.load %arg3[%c0_4, %c0_5] : memref<1x64xf32, #tpu.memory_space<vmem>>, vector<1x64xf32>
    %6 = vector.broadcast %5 : vector<1x64xf32> to vector<8x64xf32>
    %7 = arith.addf %4, %6 : vector<8x64xf32>
    %8 = arith.truncf %7 : vector<8x64xf32> to vector<8x64xbf16>
    %c0_6 = arith.constant 0 : index
    %c0_7 = arith.constant 0 : index
    %9 = vector.load %arg4[%c0_6, %c0_7] : memref<64x4xbf16, #tpu.memory_space<vmem>>, vector<64x4xbf16>
    %cst_8 = arith.constant dense<0.000000e+00> : vector<8x4xf32>
    %10 = tpu.matmul %8, %9, %cst_8 {dimension_numbers = #tpu.dot_dimension_numbers<[1], [0], [0], [1], [0, 0, 1, 1], [], []>} : vector<8x64xbf16>, vector<64x4xbf16>, vector<8x4xf32> -> vector<8x4xf32>
    %c0_9 = arith.constant 0 : index
    %c0_10 = arith.constant 0 : index
    %11 = vector.load %arg5[%c0_9, %c0_10] : memref<1x4xf32, #tpu.memory_space<vmem>>, vector<1x4xf32>
    %12 = vector.broadcast %11 : vector<1x4xf32> to vector<8x4xf32>
    %13 = arith.addf %10, %12 : vector<8x4xf32>
    %14 = arith.negf %13 : vector<8x4xf32>
    %15 = math.exp %14 : vector<8x4xf32>
    %cst_11 = arith.constant 1.000000e+00 : f32
    %16 = vector.broadcast %cst_11 : f32 to vector<8x4xf32>
    %17 = arith.addf %16, %15 : vector<8x4xf32>
    %18 = arith.divf %16, %17 : vector<8x4xf32>
    %c0_12 = arith.constant 0 : index
    %c0_13 = arith.constant 0 : index
    %19 = vector.load %arg8[%c0_12, %c0_13] : memref<8x1xf32, #tpu.memory_space<vmem>>, vector<8x1xf32>
    %c0_14 = arith.constant 0 : index
    %c0_15 = arith.constant 0 : index
    %20 = vector.load %arg9[%c0_14, %c0_15] : memref<8x1xf32, #tpu.memory_space<vmem>>, vector<8x1xf32>
    %cst_16 = arith.constant 0.000000e+00 : f32
    %21 = vector.broadcast %cst_16 : f32 to vector<16x16xf32>
    %cst_17 = arith.constant 0.000000e+00 : f32
    %22 = vector.broadcast %cst_17 : f32 to vector<1x16xf32>
    %c0_18 = arith.constant 0 : index
    %c0_19 = arith.constant 0 : index
    %c0_20 = arith.constant 0 : index
    %23 = vector.load %arg6[%c0_18, %c0_19, %c0_20] : memref<4x64x16xbf16, #tpu.memory_space<vmem>>, vector<1x64x16xbf16>
    %24 = vector.shape_cast %23 : vector<1x64x16xbf16> to vector<64x16xbf16>
    %cst_21 = arith.constant dense<0.000000e+00> : vector<8x16xf32>
    %25 = tpu.matmul %8, %24, %cst_21 {dimension_numbers = #tpu.dot_dimension_numbers<[1], [0], [0], [1], [0, 0, 1, 1], [], []>} : vector<8x64xbf16>, vector<64x16xbf16>, vector<8x16xf32> -> vector<8x16xf32>
    %c0_22 = arith.constant 0 : index
    %c0_23 = arith.constant 0 : index
    %c0_24 = arith.constant 0 : index
    %26 = vector.load %arg7[%c0_22, %c0_23, %c0_24] : memref<4x1x16xf32, #tpu.memory_space<vmem>>, vector<1x1x16xf32>
    %27 = vector.shape_cast %26 : vector<1x1x16xf32> to vector<1x16xf32>
    %28 = vector.broadcast %27 : vector<1x16xf32> to vector<8x16xf32>
    %29 = arith.addf %25, %28 : vector<8x16xf32>
    %30 = vector.broadcast %19 : vector<8x1xf32> to vector<8x16xf32>
    %31 = arith.mulf %29, %30 : vector<8x16xf32>
    %32 = vector.broadcast %20 : vector<8x1xf32> to vector<8x16xf32>
    %33 = arith.addf %31, %32 : vector<8x16xf32>
    %cst_25 = arith.constant dense<0xFF800000> : vector<8xf32>
    %34 = vector.multi_reduction <maximumf>, %33, %cst_25 [1] : vector<8x16xf32> to vector<8xf32>
    %35 = vector.shape_cast %34 : vector<8xf32> to vector<8x1xf32>
    %36 = vector.broadcast %35 : vector<8x1xf32> to vector<8x16xf32>
    %37 = arith.subf %33, %36 : vector<8x16xf32>
    %38 = math.exp %37 : vector<8x16xf32>
    %cst_26 = arith.constant dense<0.000000e+00> : vector<8xf32>
    %39 = vector.multi_reduction <add>, %38, %cst_26 [1] : vector<8x16xf32> to vector<8xf32>
    %40 = vector.shape_cast %39 : vector<8xf32> to vector<8x1xf32>
    %41 = tpu.reciprocal %40 {approx = true} : vector<8x1xf32> -> vector<8x1xf32>
    %42 = vector.broadcast %41 : vector<8x1xf32> to vector<8x16xf32>
    %43 = arith.mulf %38, %42 : vector<8x16xf32>
    %44 = vector.extract_strided_slice %18 {offsets = [0, 0], sizes = [8, 1], strides = [1, 1]} : vector<8x4xf32> to vector<8x1xf32>
    %45 = vector.broadcast %44 : vector<8x1xf32> to vector<8x16xf32>
    %46 = arith.mulf %43, %45 : vector<8x16xf32>
    %cst_27 = arith.constant dense<0.000000e+00> : vector<16xf32>
    %47 = vector.multi_reduction <add>, %46, %cst_27 [0] : vector<8x16xf32> to vector<16xf32>
    %48 = vector.shape_cast %47 : vector<16xf32> to vector<1x16xf32>
    %49 = arith.addf %22, %48 : vector<1x16xf32>
    %50 = vector.extract_strided_slice %7 {offsets = [0, 0], sizes = [8, 16], strides = [1, 1]} : vector<8x64xf32> to vector<8x16xf32>
    %51 = arith.truncf %50 : vector<8x16xf32> to vector<8x16xbf16>
    %52 = arith.truncf %46 : vector<8x16xf32> to vector<8x16xbf16>
    %cst_28 = arith.constant dense<0.000000e+00> : vector<16x16xf32>
    %53 = tpu.matmul %51, %52, %cst_28 {dimension_numbers = #tpu.dot_dimension_numbers<[0], [0], [1], [1], [0, 1, 1, 1], [], []>} : vector<8x16xbf16>, vector<8x16xbf16>, vector<16x16xf32> -> vector<16x16xf32>
    %54 = arith.addf %21, %53 : vector<16x16xf32>
    %c1 = arith.constant 1 : index
    %c0_29 = arith.constant 0 : index
    %c0_30 = arith.constant 0 : index
    %55 = vector.load %arg6[%c1, %c0_29, %c0_30] : memref<4x64x16xbf16, #tpu.memory_space<vmem>>, vector<1x64x16xbf16>
    %56 = vector.shape_cast %55 : vector<1x64x16xbf16> to vector<64x16xbf16>
    %cst_31 = arith.constant dense<0.000000e+00> : vector<8x16xf32>
    %57 = tpu.matmul %8, %56, %cst_31 {dimension_numbers = #tpu.dot_dimension_numbers<[1], [0], [0], [1], [0, 0, 1, 1], [], []>} : vector<8x64xbf16>, vector<64x16xbf16>, vector<8x16xf32> -> vector<8x16xf32>
    %c1_32 = arith.constant 1 : index
    %c0_33 = arith.constant 0 : index
    %c0_34 = arith.constant 0 : index
    %58 = vector.load %arg7[%c1_32, %c0_33, %c0_34] : memref<4x1x16xf32, #tpu.memory_space<vmem>>, vector<1x1x16xf32>
    %59 = vector.shape_cast %58 : vector<1x1x16xf32> to vector<1x16xf32>
    %60 = vector.broadcast %59 : vector<1x16xf32> to vector<8x16xf32>
    %61 = arith.addf %57, %60 : vector<8x16xf32>
    %62 = vector.broadcast %19 : vector<8x1xf32> to vector<8x16xf32>
    %63 = arith.mulf %61, %62 : vector<8x16xf32>
    %64 = vector.broadcast %20 : vector<8x1xf32> to vector<8x16xf32>
    %65 = arith.addf %63, %64 : vector<8x16xf32>
    %cst_35 = arith.constant dense<0xFF800000> : vector<8xf32>
    %66 = vector.multi_reduction <maximumf>, %65, %cst_35 [1] : vector<8x16xf32> to vector<8xf32>
    %67 = vector.shape_cast %66 : vector<8xf32> to vector<8x1xf32>
    %68 = vector.broadcast %67 : vector<8x1xf32> to vector<8x16xf32>
    %69 = arith.subf %65, %68 : vector<8x16xf32>
    %70 = math.exp %69 : vector<8x16xf32>
    %cst_36 = arith.constant dense<0.000000e+00> : vector<8xf32>
    %71 = vector.multi_reduction <add>, %70, %cst_36 [1] : vector<8x16xf32> to vector<8xf32>
    %72 = vector.shape_cast %71 : vector<8xf32> to vector<8x1xf32>
    %73 = tpu.reciprocal %72 {approx = true} : vector<8x1xf32> -> vector<8x1xf32>
    %74 = vector.broadcast %73 : vector<8x1xf32> to vector<8x16xf32>
    %75 = arith.mulf %70, %74 : vector<8x16xf32>
    %76 = vector.extract_strided_slice %18 {offsets = [0, 1], sizes = [8, 1], strides = [1, 1]} : vector<8x4xf32> to vector<8x1xf32>
    %77 = vector.broadcast %76 : vector<8x1xf32> to vector<8x16xf32>
    %78 = arith.mulf %75, %77 : vector<8x16xf32>
    %cst_37 = arith.constant dense<0.000000e+00> : vector<16xf32>
    %79 = vector.multi_reduction <add>, %78, %cst_37 [0] : vector<8x16xf32> to vector<16xf32>
    %80 = vector.shape_cast %79 : vector<16xf32> to vector<1x16xf32>
    %81 = arith.addf %49, %80 : vector<1x16xf32>
    %82 = vector.extract_strided_slice %7 {offsets = [0, 16], sizes = [8, 16], strides = [1, 1]} : vector<8x64xf32> to vector<8x16xf32>
    %83 = arith.truncf %82 : vector<8x16xf32> to vector<8x16xbf16>
    %84 = arith.truncf %78 : vector<8x16xf32> to vector<8x16xbf16>
    %cst_38 = arith.constant dense<0.000000e+00> : vector<16x16xf32>
    %85 = tpu.matmul %83, %84, %cst_38 {dimension_numbers = #tpu.dot_dimension_numbers<[0], [0], [1], [1], [0, 1, 1, 1], [], []>} : vector<8x16xbf16>, vector<8x16xbf16>, vector<16x16xf32> -> vector<16x16xf32>
    %86 = arith.addf %54, %85 : vector<16x16xf32>
    %c2 = arith.constant 2 : index
    %c0_39 = arith.constant 0 : index
    %c0_40 = arith.constant 0 : index
    %87 = vector.load %arg6[%c2, %c0_39, %c0_40] : memref<4x64x16xbf16, #tpu.memory_space<vmem>>, vector<1x64x16xbf16>
    %88 = vector.shape_cast %87 : vector<1x64x16xbf16> to vector<64x16xbf16>
    %cst_41 = arith.constant dense<0.000000e+00> : vector<8x16xf32>
    %89 = tpu.matmul %8, %88, %cst_41 {dimension_numbers = #tpu.dot_dimension_numbers<[1], [0], [0], [1], [0, 0, 1, 1], [], []>} : vector<8x64xbf16>, vector<64x16xbf16>, vector<8x16xf32> -> vector<8x16xf32>
    %c2_42 = arith.constant 2 : index
    %c0_43 = arith.constant 0 : index
    %c0_44 = arith.constant 0 : index
    %90 = vector.load %arg7[%c2_42, %c0_43, %c0_44] : memref<4x1x16xf32, #tpu.memory_space<vmem>>, vector<1x1x16xf32>
    %91 = vector.shape_cast %90 : vector<1x1x16xf32> to vector<1x16xf32>
    %92 = vector.broadcast %91 : vector<1x16xf32> to vector<8x16xf32>
    %93 = arith.addf %89, %92 : vector<8x16xf32>
    %94 = vector.broadcast %19 : vector<8x1xf32> to vector<8x16xf32>
    %95 = arith.mulf %93, %94 : vector<8x16xf32>
    %96 = vector.broadcast %20 : vector<8x1xf32> to vector<8x16xf32>
    %97 = arith.addf %95, %96 : vector<8x16xf32>
    %cst_45 = arith.constant dense<0xFF800000> : vector<8xf32>
    %98 = vector.multi_reduction <maximumf>, %97, %cst_45 [1] : vector<8x16xf32> to vector<8xf32>
    %99 = vector.shape_cast %98 : vector<8xf32> to vector<8x1xf32>
    %100 = vector.broadcast %99 : vector<8x1xf32> to vector<8x16xf32>
    %101 = arith.subf %97, %100 : vector<8x16xf32>
    %102 = math.exp %101 : vector<8x16xf32>
    %cst_46 = arith.constant dense<0.000000e+00> : vector<8xf32>
    %103 = vector.multi_reduction <add>, %102, %cst_46 [1] : vector<8x16xf32> to vector<8xf32>
    %104 = vector.shape_cast %103 : vector<8xf32> to vector<8x1xf32>
    %105 = tpu.reciprocal %104 {approx = true} : vector<8x1xf32> -> vector<8x1xf32>
    %106 = vector.broadcast %105 : vector<8x1xf32> to vector<8x16xf32>
    %107 = arith.mulf %102, %106 : vector<8x16xf32>
    %108 = vector.extract_strided_slice %18 {offsets = [0, 2], sizes = [8, 1], strides = [1, 1]} : vector<8x4xf32> to vector<8x1xf32>
    %109 = vector.broadcast %108 : vector<8x1xf32> to vector<8x16xf32>
    %110 = arith.mulf %107, %109 : vector<8x16xf32>
    %cst_47 = arith.constant dense<0.000000e+00> : vector<16xf32>
    %111 = vector.multi_reduction <add>, %110, %cst_47 [0] : vector<8x16xf32> to vector<16xf32>
    %112 = vector.shape_cast %111 : vector<16xf32> to vector<1x16xf32>
    %113 = arith.addf %81, %112 : vector<1x16xf32>
    %114 = vector.extract_strided_slice %7 {offsets = [0, 32], sizes = [8, 16], strides = [1, 1]} : vector<8x64xf32> to vector<8x16xf32>
    %115 = arith.truncf %114 : vector<8x16xf32> to vector<8x16xbf16>
    %116 = arith.truncf %110 : vector<8x16xf32> to vector<8x16xbf16>
    %cst_48 = arith.constant dense<0.000000e+00> : vector<16x16xf32>
    %117 = tpu.matmul %115, %116, %cst_48 {dimension_numbers = #tpu.dot_dimension_numbers<[0], [0], [1], [1], [0, 1, 1, 1], [], []>} : vector<8x16xbf16>, vector<8x16xbf16>, vector<16x16xf32> -> vector<16x16xf32>
    %118 = arith.addf %86, %117 : vector<16x16xf32>
    %c3 = arith.constant 3 : index
    %c0_49 = arith.constant 0 : index
    %c0_50 = arith.constant 0 : index
    %119 = vector.load %arg6[%c3, %c0_49, %c0_50] : memref<4x64x16xbf16, #tpu.memory_space<vmem>>, vector<1x64x16xbf16>
    %120 = vector.shape_cast %119 : vector<1x64x16xbf16> to vector<64x16xbf16>
    %cst_51 = arith.constant dense<0.000000e+00> : vector<8x16xf32>
    %121 = tpu.matmul %8, %120, %cst_51 {dimension_numbers = #tpu.dot_dimension_numbers<[1], [0], [0], [1], [0, 0, 1, 1], [], []>} : vector<8x64xbf16>, vector<64x16xbf16>, vector<8x16xf32> -> vector<8x16xf32>
    %c3_52 = arith.constant 3 : index
    %c0_53 = arith.constant 0 : index
    %c0_54 = arith.constant 0 : index
    %122 = vector.load %arg7[%c3_52, %c0_53, %c0_54] : memref<4x1x16xf32, #tpu.memory_space<vmem>>, vector<1x1x16xf32>
    %123 = vector.shape_cast %122 : vector<1x1x16xf32> to vector<1x16xf32>
    %124 = vector.broadcast %123 : vector<1x16xf32> to vector<8x16xf32>
    %125 = arith.addf %121, %124 : vector<8x16xf32>
    %126 = vector.broadcast %19 : vector<8x1xf32> to vector<8x16xf32>
    %127 = arith.mulf %125, %126 : vector<8x16xf32>
    %128 = vector.broadcast %20 : vector<8x1xf32> to vector<8x16xf32>
    %129 = arith.addf %127, %128 : vector<8x16xf32>
    %cst_55 = arith.constant dense<0xFF800000> : vector<8xf32>
    %130 = vector.multi_reduction <maximumf>, %129, %cst_55 [1] : vector<8x16xf32> to vector<8xf32>
    %131 = vector.shape_cast %130 : vector<8xf32> to vector<8x1xf32>
    %132 = vector.broadcast %131 : vector<8x1xf32> to vector<8x16xf32>
    %133 = arith.subf %129, %132 : vector<8x16xf32>
    %134 = math.exp %133 : vector<8x16xf32>
    %cst_56 = arith.constant dense<0.000000e+00> : vector<8xf32>
    %135 = vector.multi_reduction <add>, %134, %cst_56 [1] : vector<8x16xf32> to vector<8xf32>
    %136 = vector.shape_cast %135 : vector<8xf32> to vector<8x1xf32>
    %137 = tpu.reciprocal %136 {approx = true} : vector<8x1xf32> -> vector<8x1xf32>
    %138 = vector.broadcast %137 : vector<8x1xf32> to vector<8x16xf32>
    %139 = arith.mulf %134, %138 : vector<8x16xf32>
    %140 = vector.extract_strided_slice %18 {offsets = [0, 3], sizes = [8, 1], strides = [1, 1]} : vector<8x4xf32> to vector<8x1xf32>
    %141 = vector.broadcast %140 : vector<8x1xf32> to vector<8x16xf32>
    %142 = arith.mulf %139, %141 : vector<8x16xf32>
    %cst_57 = arith.constant dense<0.000000e+00> : vector<16xf32>
    %143 = vector.multi_reduction <add>, %142, %cst_57 [0] : vector<8x16xf32> to vector<16xf32>
    %144 = vector.shape_cast %143 : vector<16xf32> to vector<1x16xf32>
    %145 = arith.addf %113, %144 : vector<1x16xf32>
    %146 = vector.extract_strided_slice %7 {offsets = [0, 48], sizes = [8, 16], strides = [1, 1]} : vector<8x64xf32> to vector<8x16xf32>
    %147 = arith.truncf %146 : vector<8x16xf32> to vector<8x16xbf16>
    %148 = arith.truncf %142 : vector<8x16xf32> to vector<8x16xbf16>
    %cst_58 = arith.constant dense<0.000000e+00> : vector<16x16xf32>
    %149 = tpu.matmul %147, %148, %cst_58 {dimension_numbers = #tpu.dot_dimension_numbers<[0], [0], [1], [1], [0, 1, 1, 1], [], []>} : vector<8x16xbf16>, vector<8x16xbf16>, vector<16x16xf32> -> vector<16x16xf32>
    %150 = arith.addf %118, %149 : vector<16x16xf32>
    %c0_59 = arith.constant 0 : index
    %c0_60 = arith.constant 0 : index
    %151 = vector.load %arg10[%c0_59, %c0_60] : memref<16x16xf32, #tpu.memory_space<vmem>>, vector<16x16xf32>
    %152 = vector.broadcast %145 : vector<1x16xf32> to vector<16x16xf32>
    %153 = arith.mulf %152, %151 : vector<16x16xf32>
    %154 = arith.subf %150, %153 : vector<16x16xf32>
    %155 = arith.mulf %154, %154 : vector<16x16xf32>
    %cst_61 = arith.constant dense<0.000000e+00> : vector<16xf32>
    %156 = vector.multi_reduction <add>, %155, %cst_61 [0] : vector<16x16xf32> to vector<16xf32>
    %157 = vector.shape_cast %156 : vector<16xf32> to vector<1x16xf32>
    %cst_62 = arith.constant 1.000000e-24 : f32
    %158 = vector.broadcast %cst_62 : f32 to vector<1x16xf32>
    %159 = arith.maximumf %157, %158 : vector<1x16xf32>
    %160 = math.rsqrt %159 : vector<1x16xf32>
    %161 = vector.broadcast %160 : vector<1x16xf32> to vector<16x16xf32>
    %162 = arith.mulf %154, %161 : vector<16x16xf32>
    %c0_63 = arith.constant 0 : index
    %c0_64 = arith.constant 0 : index
    %c0_65 = arith.constant 0 : index
    %163 = vector.load %arg11[%c0_63, %c0_64, %c0_65] : memref<1x16x16xf32, #tpu.memory_space<vmem>>, vector<1x16x16xf32>
    %164 = vector.shape_cast %163 : vector<1x16x16xf32> to vector<16x16xf32>
    %165 = vector.shape_cast %162 : vector<16x16xf32> to vector<1x16x16xf32>
    tpu.vector_store %arg11[%c0_63, %c0_64, %c0_65], %165 {strides = array<i32>} : memref<1x16x16xf32, #tpu.memory_space<vmem>>, vector<1x16x16xf32>,
    return
  }
  func.func @transform_0(%arg0: i32) -> (i32, i32, i32) {
    %c0_i32 = arith.constant 0 : i32
    %c0_i32_0 = arith.constant 0 : i32
    %c0_i32_1 = arith.constant 0 : i32
    return %arg0, %c0_i32, %c0_i32_0 : i32, i32, i32
  }
  func.func @transform_1(%arg0: i32) -> (i32, i32) {
    %c0_i32 = arith.constant 0 : i32
    %c0_i32_0 = arith.constant 0 : i32
    %c0_i32_1 = arith.constant 0 : i32
    return %c0_i32, %c0_i32_0 : i32, i32
  }
  func.func @transform_2(%arg0: i32) -> (i32, i32) {
    %c0_i32 = arith.constant 0 : i32
    %c0_i32_0 = arith.constant 0 : i32
    %c0_i32_1 = arith.constant 0 : i32
    return %c0_i32, %c0_i32_0 : i32, i32
  }
  func.func @transform_3(%arg0: i32) -> (i32, i32) {
    %c0_i32 = arith.constant 0 : i32
    %c0_i32_0 = arith.constant 0 : i32
    %c0_i32_1 = arith.constant 0 : i32
    return %c0_i32, %c0_i32_0 : i32, i32
  }
  func.func @transform_4(%arg0: i32) -> (i32, i32) {
    %c0_i32 = arith.constant 0 : i32
    %c0_i32_0 = arith.constant 0 : i32
    %c0_i32_1 = arith.constant 0 : i32
    return %c0_i32, %c0_i32_0 : i32, i32
  }
  func.func @transform_5(%arg0: i32) -> (i32, i32, i32) {
    %c0_i32 = arith.constant 0 : i32
    %c0_i32_0 = arith.constant 0 : i32
    %c0_i32_1 = arith.constant 0 : i32
    %c0_i32_2 = arith.constant 0 : i32
    return %c0_i32, %c0_i32_0, %c0_i32_1 : i32, i32, i32
  }
  func.func @transform_6(%arg0: i32) -> (i32, i32, i32) {
    %c0_i32 = arith.constant 0 : i32
    %c0_i32_0 = arith.constant 0 : i32
    %c0_i32_1 = arith.constant 0 : i32
    %c0_i32_2 = arith.constant 0 : i32
    return %c0_i32, %c0_i32_0, %c0_i32_1 : i32, i32, i32
  }
  func.func @transform_7(%arg0: i32) -> (i32, i32) {
    %c0_i32 = arith.constant 0 : i32
    %c0_i32_0 = arith.constant 0 : i32
    %c0_i32_1 = arith.constant 0 : i32
    return %c0_i32, %c0_i32_0 : i32, i32
  }
  func.func @transform_8(%arg0: i32) -> (i32, i32) {
    %c0_i32 = arith.constant 0 : i32
    %c0_i32_0 = arith.constant 0 : i32
    %c0_i32_1 = arith.constant 0 : i32
    return %c0_i32, %c0_i32_0 : i32, i32
  }
  func.func @transform_9(%arg0: i32) -> (i32, i32) {
    %c0_i32 = arith.constant 0 : i32
    %c0_i32_0 = arith.constant 0 : i32
    %c0_i32_1 = arith.constant 0 : i32
    return %c0_i32, %c0_i32_0 : i32, i32
  }
  func.func @transform_10(%arg0: i32) -> (i32, i32, i32) {
    %c0_i32 = arith.constant 0 : i32
    %c0_i32_0 = arith.constant 0 : i32
    %c0_i32_1 = arith.constant 0 : i32
    return %arg0, %c0_i32, %c0_i32_0 : i32, i32, i32
  }
}

</mosaic_0001>

<bundles_post_ra>
// kernel: tpu_custom_call.1
= control target key start
LH: loop header
LB: loop body
LE: loop exit
PB: predicated region body
PF: predicated region fallthrough
CT: control target
= control target key end

     0   :  { %15 = vsyncpa [#allocation3], 0  ;;  %s2066_s0 = inlined_call_operand.vmem [shape: f32[2,8,32], index: 0, kind: input, shape index: {}]   ;;  %s2067_s1 = inlined_call_operand.vmem [shape: bf16[32,64], index: 1, kind: input, shape index: {}]   ;;  %s2068_s2 = inlined_call_operand.vmem [shape: f32[1,64], index: 2, kind: input, shape index: {}]   ;;  %s2069_s3 = inlined_call_operand.vmem [shape: bf16[64,4], index: 3, kind: input, shape index: {}]   ;;  %s2070_s4 = inlined_call_operand.vmem [shape: f32[1,4], index: 4, kind: input, shape index: {}]   ;;  %s2071_s5 = inlined_call_operand.vmem [shape: bf16[4,64,16], index: 5, kind: input, shape index: {}]   ;;  %s2072_s6 = inlined_call_operand.vmem [shape: f32[4,1,16], index: 6, kind: input, shape index: {}]   ;;  %s2073_s7 = inlined_call_operand.vmem [shape: f32[8,1], index: 7, kind: input, shape index: {}]   ;;  %s2074_s8 = inlined_call_operand.vmem [shape: f32[8,1], index: 8, kind: input, shape index: {}]   ;;  %s2075_s9 = inlined_call_operand.vmem [shape: f32[16,16], index: 9, kind: input, shape index: {}]   ;;  %s2076_s10 = inlined_call_operand.hbm [shape: f32[2,16,16], index: 10, kind: output, shape index: {}]  }
   0x1   :  { %17 = vsyncpa [#allocation3 + $0x1], 0  ;;  %s1761_s13 = smov 0   ;;  %s1763_s14 = smov 0  }
   0x2   :  { %s1765_s15 = smov 0   ;;  %s1767_s16 = smov 0  }
   0x3 LB: > { %s1782_s17 = sadd.s32 4294967295, %s1692_s16   ;;  %s1326_s18 = sadd.s32 4294967294, %s1692_s16   ;;  %s1692_s16 = sphi %s1767_s16, %s2082_s16   ;;  %s1688_s15 = sphi %s1765_s15, %s2081_s15   ;;  %s1684_s14 = sphi %s1763_s14, %s2080_s14   ;;  %s1680_s13 = sphi %s1761_s13, %s2079_s13  }
   0x4   : > { %s1786_s19 = sadd.s32 1, %s1692_s16   ;;  %s245_s20 = sadd.s32 1, %s1688_s15 }
   0x5   : > { %s242_s21 = ssub.s32 %s1692_s16, %s1786_s19  ;;  %p255_p0 = scmp.ne.s32.totalorder %s1688_s15, %s1684_s14 }
   0x6   : > { %p243_p1 = scmp.eq.s32.totalorder %s242_s21, 0  ;;  %p256_p2 = scmp.eq.s32.totalorder %s1782_s17, 1 }
   0x7   : > { %p261_p3 = scmp.ne.s32.totalorder %s1684_s14, %s1680_s13  ;;  %p262_p4 = scmp.eq.s32.totalorder %s1326_s18, 1 }
   0x8   : > { %s1797_s22 = scalar_select %p243_p1, %s1688_s15, %s245_s20  }
   0x9   : > { %p1799_p5 = por %p256_p2, %p255_p0  ;;  %p1803_p6 = por %p262_p4, %p261_p3 }
   0xa   : > { %p1329_p7 = scmp.ge.s32.totalorder %s1692_s16, 1  ;;  %p314_p8 = scmp.lt.s32.totalorder %s1692_s16, 3 }
   0xc   : > { %p315_p9 = pnand %p1329_p7, %p314_p8 }
   0xd   : > { %p351_p10 = scmp.lt.s32.totalorder (!%p315_p9), %s1782_s17, 1  ;;  %s1698_s25 = smov (!%p315_p9), 112  }
   0xe   : > { %318 = sbr.rel (%p315_p9) target bundleno = 1569 (0x621), region = 60  ;;  %s1403_s18 = sshll.u32 (!%p315_p9), %s1782_s17, 8 }
   0xf   : > { %s2020_s27 = scalar_lea.hbm (!%p315_p9), %s2076_s10, %s1403_s18  ;;  %s1703_s29 = smov (!%p315_p9), [#allocation2]  }
  0x10   : > { %s1636_s30 = sshll.u32 (!%p315_p9), %s1703_s29, 4  ;;  %s1637_s30 = int_to_ptr.vmem [resolvable:$false] %s1636_s30 }
  0x13   : > { %v1588_v0 = vld [vmem:[%s2067_s1 + $0x8] sm:$0xff]   ;;  %v1694_v1 = vmov 0.0   ;;  %v1589_v2 = vld [vmem:[%s2067_s1] sm:$0xff]   ;;  %vm1695_vm0 = vmmov 0   ;;  %v1590_v3 = vld [vmem:[%s2069_s3 + $0x18] sm:$0xff]   ;;  %s352_s11 = scalar_select %p351_p10, %s1782_s17, 1 }
  0x14   : > { %1440 = vmatprep.subr.bf16.mxu0 %v1694_v1  ;;  %1448 = vmatprep.subr.bf16.mxu1 %v1694_v1  ;;  %v1592_v4 = vld [vmem:[%s2069_s3 + $0x10] sm:$0xff]   ;;  %vm381_vm1 = vcmask 261120   ;;  %v1591_v6 = vld [vmem:[%s2071_s5 + $0x18] sm:$0xff]   ;;  %v1594_v7 = vld [vmem:[%s2069_s3 + $0x8] sm:$0xff]   ;;  %v1696_v14 = vmov 0   ;;  %vm465_vm2 = vcmask 523264  }
  0x15   : > { %1441 = vmatpush3.bf16.msra.mxu0 %v1588_v0  ;;  %1444 = vmatprep.mubr.msk.bf16.mxu0 %vm1695_vm0, %v1694_v1  ;;  %s1331_s20 = sshll.u32 %s352_s11, 3  ;;  %v1593_v9 = vld [vmem:[%s2071_s5 + $0x10] sm:$0xff]   ;;  %v1595_v10 = vld [vmem:[%s2071_s5 + $0x8] sm:$0xff]   ;;  %v1596_v11 = vld [vmem:[%s2069_s3] sm:$0xff]   ;;  %v1697_v31 = vmov 1   ;;  %vm608_vm3 = vcmask 130048  }
  0x16   : > { %1442 = vmatprep.subr.bf16.mxu0 %v1694_v1  ;;  %1456 = vmatprep.mubr.msk.bf16.mxu1 %vm1695_vm0, %v1694_v1  ;;  %s354_s26 = scalar_lea.vmem %s2066_s0, %s1331_s20  ;;  %v1597_v12 = vld [vmem:[%s2071_s5] sm:$0xff]   ;;  %v1598_v20 = vld [vmem:[%s2071_s5 + $0x38] sm:$0xff]   ;;  %v1599_v24 = vld [vmem:[%s2071_s5 + $0x30] sm:$0xff]   ;;  %vm767_vm4 = vcmask 1043456   ;;  %vm763_vm5 = vcmask 64512   ;;  %s348_s11 = sand.u32 1, %s1684_s14  }
  0x17   : > { %1449 = vmatpush3.bf16.msra.mxu1 %v1590_v3  ;;  %v356_v5 = vld [vmem:[%s354_s26] sm:$0xff]  ;;  %1582 = vset.pattern.permute.xlu0 %v1696_v14  ;;  %v1600_v25 = vld [vmem:[%s2071_s5 + $0x28] sm:$0xff]   ;;  %v1602_v27 = vld [vmem:[%s2071_s5 + $0x58] sm:$0xff]   ;;  %s1699_s26 = smov 96   ;;  %s1330_s12 = sshll.u32 %s348_s11, 4 }
  0x18   : > { %1450 = vmatprep.subr.bf16.mxu1 %v1694_v1  ;;  %v357_v8 = vpack.c.bf16 %v356_v5, %v356_v5  ;;  %v515_v13 = vld [vmem:[%s2073_s7] sm:$0xff]  ;;  %1584 = vset.pattern.permute.xlu1 %v1696_v14  ;;  %v1603_v28 = vld [vmem:[%s2071_s5 + $0x50] sm:$0xff]   ;;  %v1604_v29 = vld [vmem:[%s2071_s5 + $0x48] sm:$0xff]   ;;  %s350_s20 = scalar_lea.vmem [#allocation2], %s1330_s12  ;;  %s2026_s17 = scalar_lea.sflag [#allocation3], %s348_s11 }
  0x19   : > { %1443 = vmatpush3.bf16.msra.mxu0 %v1589_v2  ;;  %598 = vperm.xlu0 %1582, %v515_v13   ;;  %v516_v15 = vld [vmem:[%s2074_s8] sm:$0xff]  ;;  %s1264_s21 = sshll.u32 %s350_s20, 4  ;;  %s1638_s12 = scalar_lea.vmem %s1637_s30, 512  ;;  %s2022_s21 = int_to_ptr.vmem [resolvable:$true] %s1264_s21 }
  0x1a   : > { %1460 = vmatprep.subr.bf16.mxu0 %v1694_v1  ;;  %v1332_v16 = vld [vmem:[%s2068_s2] ss:$0 sm:$0xff]  ;;  %v1358_v42 = vld [vmem:[%s2072_s6 + $0x1] ss:$0 sm:$0xff]  ;;  %v1375_v59 = vld [vmem:[%s2072_s6 + $0x2] ss:$0 sm:$0xff]  ;;  %p1639_p0 = scmp.lt.s32.totalorder %s2022_s21, %s1637_s30 }
  0x1b   : > { %1451 = vmatpush3.bf16.msra.mxu1 %v1592_v4  ;;  %v1601_v26 = vld [vmem:[%s2071_s5 + $0x20] sm:$0xff]   ;;  %s1632_s28 = scalar_lea.vmem %s2022_s21, 256 }
  0x1c   : > { %1452 = vmatprep.subr.bf16.mxu1 %v1694_v1  ;;  %1445 = vmatmul.mubr.msk.bf16.vlgmr.msra.gmra.mxu0 %vm381_vm1, %v357_v8  ;;  %v1605_v30 = vld [vmem:[%s2071_s5 + $0x40] sm:$0xff]   ;;  %v1700_v8 = vmov 2   ;;  %p1633_p11 = scmp.ne.s32.totalorder %s2022_s21, %s1632_s28  ;;  %p1640_p1 = scmp.lt.s32.totalorder %s1638_s12, %s1632_s28 }
  0x1d   : > { %1461 = vmatpush3.bf16.msra.mxu0 %v1591_v6  ;;  %1468 = vmatprep.mubr.msk.bf16.mxu0 %vm1695_vm0, %v1694_v1  ;;  %v1343_v40 = vld [vmem:[%s2072_s6] ss:$0 sm:$0xff] }
  0x1e   : > { %1462 = vmatprep.subr.bf16.mxu0 %v1694_v1  ;;  %604 = vperm.xlu0 %1582, %v516_v15   ;;  %v1336_v51 = vld [vmem:[%s2070_s4] ss:$0 sm:$0xff]  ;;  %p1634_p12 = pnand %p1633_p11, %p1799_p5  ;;  %p1641_p2 = por %p1640_p1, %p1639_p0 }
  0x1f   : > { %1453 = vmatpush3.bf16.msra.mxu1 %v1594_v7 }
  0x20   : > { %1454 = vmatprep.subr.bf16.mxu1 %v1694_v1  ;;  %p1635_p13 = pneg %p1634_p12 }
  0x21   : > { %1463 = vmatpush3.bf16.msra.mxu0 %v1593_v9 }
  0x22   : > { %1464 = vmatprep.subr.bf16.mxu0 %v1694_v1  ;;  %1583 = vset.pattern.permute.xlu0 %v1697_v31  ;;  %p1642_p3 = pnand %p1641_p2, %p1635_p13 }
  0x23   : > { %1455 = vmatpush3.bf16.msra.mxu1 %v1596_v11 }
  0x24   : > { %1472 = vmatprep.subr.bf16.mxu1 %v1694_v1 }
  0x25   : > { %1465 = vmatpush3.bf16.msra.mxu0 %v1595_v10 }
  0x26   : > { %1466 = vmatprep.subr.bf16.mxu0 %v1694_v1 }
  0x29   : > { %1467 = vmatpush3.bf16.msra.mxu0 %v1597_v12 }
  0x2a   : > { %1484 = vmatprep.subr.bf16.mxu0 %v1694_v1 }
  0x94   : > { %v1924_v41 = vpop.permute.xlu0 %598 }
  0x99   : > { %v1931_v49 = vpop.permute.xlu0 %604 }
  0xdc   : > { %v419_v17 = vpop.f32.mrf.mxu0 }
  0xdd   : > { %v420_v18 = vadd.f32 %v1332_v16, %v419_v17 }
  0xde   : > { %v1446_v19 = vpop.f32.mrf.mxu0 }
  0xdf   : > { %v1874_v21 = vpack.c.bf16 %v420_v18, %v420_v18 }
  0xe0   : > { %v422_v22 = vpop.f32.mrf.mxu0 }
  0xe1   : > { %1457 = vmatmul.mubr.msk.bf16.vlgmr.msra.gmra.mxu1 %vm465_vm2, %v1874_v21  ;;  %1469 = vmatmul.mubr.msk.bf16.vlgmr.msra.gmra.mxu0 %vm465_vm2, %v1874_v21 }
  0xe2   : > { %1473 = vmatpush3.bf16.msra.mxu1 %v1598_v20  ;;  %v1447_v23 = vpop.f32.mrf.mxu0  ;;  %1480 = vmatprep.mubr.msk.bf16.mxu1 %vm1695_vm0, %v1694_v1 }
  0xe3   : > { %1474 = vmatprep.subr.bf16.mxu1 %v1694_v1  ;;  %1486 = vmatprep.mubr.msk.bf16.mxu0 %vm1695_vm0, %v1694_v1 }
  0xe6   : > { %1475 = vmatpush3.bf16.msra.mxu1 %v1599_v24 }
  0xe7   : > { %1476 = vmatprep.subr.bf16.mxu1 %v1694_v1 }
  0xea   : > { %1477 = vmatpush3.bf16.msra.mxu1 %v1600_v25 }
  0xeb   : > { %1478 = vmatprep.subr.bf16.mxu1 %v1694_v1 }
  0xee   : > { %1479 = vmatpush3.bf16.msra.mxu1 %v1601_v26 }
  0xef   : > { %1496 = vmatprep.subr.bf16.mxu1 %v1694_v1 }
  0xf1   : > { %1481 = vmatmul.mubr.msk.bf16.vlgmr.msra.gmra.mxu1 %vm465_vm2, %v1874_v21 }
  0xf2   : > { %1497 = vmatpush3.bf16.msra.mxu1 %v1602_v27  ;;  %1504 = vmatprep.mubr.msk.bf16.mxu1 %vm1695_vm0, %v1694_v1 }
  0xf3   : > { %1498 = vmatprep.subr.bf16.mxu1 %v1694_v1 }
  0xf6   : > { %1499 = vmatpush3.bf16.msra.mxu1 %v1603_v28 }
  0xf7   : > { %1500 = vmatprep.subr.bf16.mxu1 %v1694_v1 }
  0xfa   : > { %1501 = vmatpush3.bf16.msra.mxu1 %v1604_v29 }
  0xfb   : > { %1502 = vmatprep.subr.bf16.mxu1 %v1694_v1 }
  0xfe   : > { %1503 = vmatpush3.bf16.msra.mxu1 %v1605_v30 }
  0xff   : > { %1526 = vmatprep.subr.bf16.mxu1 %v1694_v1 }
 0x101   : > { %1505 = vmatmul.mubr.msk.bf16.vlgmr.msra.gmra.mxu1 %vm465_vm2, %v1874_v21 }
 0x102   : > { %1528 = vmatprep.mubr.msk.bf16.mxu1 %vm1695_vm0, %v1694_v1 }
 0x1a1   : > { %v503_v32 = vpop.f32.mrf.mxu1  ;;  %v590_v33 = vpop.f32.mrf.mxu0 }
 0x1a2   : > { %v591_v43 = vadd.f32 %v1343_v40, %v590_v33  ;;  %v504_v56 = vadd.f32 %v1336_v51, %v503_v32 }
 0x1a3   : > { %v1458_v34 = vpop.f32.mrf.mxu1  ;;  %v1470_v35 = vpop.f32.mrf.mxu0 }
 0x1a4   : > { %v601_v47 = vmul.f32 %v1924_v41, %v591_v43  ;;  %v1342_v58 = vmul.f32 -1.442695, %v504_v56 }
 0x1a5   : > { %v506_v36 = vpop.f32.mrf.mxu1  ;;  %v593_v37 = vpop.f32.mrf.mxu0 }
 0x1a6   : > { %v607_v55 = vadd.f32 %v1931_v49, %v601_v47  ;;  %1610 = vpow2.f32 %v1342_v58 }
 0x1a7   : > { %v1459_v38 = vpop.f32.mrf.mxu1  ;;  %v1471_v39 = vpop.f32.mrf.mxu0 }
 0x1a8   : > { %v609_v57 = vsel %vm608_vm3, %v607_v55, -inf }
 0x1b1   : > { %v710_v44 = vpop.f32.mrf.mxu1 }
 0x1b2   : > { %v711_v45 = vadd.f32 %v1358_v42, %v710_v44 }
 0x1b3   : > { %v1482_v46 = vpop.f32.mrf.mxu1  ;;  %v1611_v5 = vpop.eup %1610 }
 0x1b4   : > { %v716_v48 = vmul.f32 %v711_v45, %v1924_v41  ;;  %v512_v6 = vadd.f32 1.0, %v1611_v5 }
 0x1b5   : > { %v713_v50 = vpop.f32.mrf.mxu1 }
 0x1b6   : > { %v717_v52 = vadd.f32 %v716_v48, %v1931_v49  ;;  %1612 = vrcp.f32 %v512_v6 }
 0x1b7   : > { %v1483_v53 = vpop.f32.mrf.mxu1 }
 0x1b8   : > { %v718_v54 = vsel %vm608_vm3, %v717_v52, -inf }
 0x1b9   : > { %719 = vmax.xlane.f32.xlu1 %v718_v54 }
 0x1bd   : > { %610 = vmax.xlane.f32.xlu1 %v609_v57 }
 0x1c1   : > { %v950_v60 = vpop.f32.mrf.mxu1 }
 0x1c2   : > { %v951_v61 = vadd.f32 %v1375_v59, %v950_v60 }
 0x1c3   : > { %v1506_v62 = vpop.f32.mrf.mxu1  ;;  %v1948_v7 = vpop.eup %1612 }
 0x1c4   : > { %v956_v63 = vmul.f32 %v951_v61, %v1924_v41 }
 0x1c5   : > { %v953_v0 = vpop.f32.mrf.mxu1 }
 0x1c6   : > { %v957_v2 = vadd.f32 %v956_v63, %v1931_v49 }
 0x1c7   : > { %v1507_v3 = vpop.f32.mrf.mxu1 }
 0x1c8   : > { %v958_v4 = vsel %vm608_vm3, %v957_v2, -inf }
 0x1c9   : > { %959 = vmax.xlane.f32.xlu0 %v958_v4 }
 0x1ce   : > { %744 = vrot.lane.b32.xlu1 %v1874_v21, %s1698_s25 }
 0x1df   : > { %983 = vrot.lane.b32.xlu0 %v1874_v21, %s1699_s26  ;;  %s1701_s26 = smov 80  }
 0x1e3   : > { %730 = vperm.xlu0 %1583, %v1948_v7  }
 0x1e7   : > { %1585 = vset.pattern.permute.xlu0 %v1700_v8 }
 0x1e8   : > { %970 = vperm.xlu0 %1585, %v1948_v7  }
 0x242   : > { %v720_v9 = vpop.xlane.xlu1 %719 }
 0x243   : > { %v721_v10 = vsub.f32 %v717_v52, %v720_v9 }
 0x245   : > { %v722_v13 = vmul.f32 1.442695, %v721_v10 }
 0x246   : > { %v611_v11 = vpop.xlane.xlu1 %610 }
 0x247   : > { %v612_v12 = vsub.f32 %v607_v55, %v611_v11 }
 0x249   : > { %v613_v14 = vmul.f32 1.442695, %v612_v12  ;;  %v1606_v12 = vld [vmem:[%s2071_s5 + $0x78] sm:$0xff]  }
 0x24a   : > { %v745_v25 = vpop.permute.xlu1 %744 }
 0x24b   : > { %1614 = vpow2.f32 %v613_v14 }
 0x24c   : > { %1616 = vpow2.f32 %v722_v13 }
 0x252   : > { %v960_v15 = vpop.xlane.xlu0 %959 }
 0x253   : > { %v961_v16 = vsub.f32 %v957_v2, %v960_v15  ;;  %v1607_v15 = vld [vmem:[%s2071_s5 + $0x70] sm:$0xff]  }
 0x255   : > { %v962_v17 = vmul.f32 1.442695, %v961_v16  ;;  %v1608_v16 = vld [vmem:[%s2071_s5 + $0x68] sm:$0xff]  }
 0x256   : > { %v984_v26 = vpop.permute.xlu0 %983 }
 0x257   : > { %1618 = vpow2.f32 %v962_v17  ;;  %v1609_v17 = vld [vmem:[%s2071_s5 + $0x60] sm:$0xff]  }
 0x258   : > { %v1615_v18 = vpop.eup %1614 }
 0x259   : > { %v615_v19 = vsel %vm608_vm3, %v1615_v18, 0.0  ;;  %v1617_v20 = vpop.eup %1616 }
 0x25a   : > { %616 = vadd.xlane.f32.xlu1 %v615_v19  ;;  %v724_v22 = vsel %vm608_vm3, %v1617_v20, 0.0 }
 0x25e   : > { %725 = vadd.xlane.f32.xlu1 %v724_v22  ;;  %v731_v28 = vpop.permute.xlu0 %730 }
 0x263   : > { %v971_v30 = vpop.permute.xlu0 %970 }
 0x264   : > { %v1619_v23 = vpop.eup %1618 }
 0x265   : > { %v964_v24 = vsel %vm608_vm3, %v1619_v23, 0.0 }
 0x266   : > { %965 = vadd.xlane.f32.xlu0 %v964_v24 }
 0x26f   : > { %622 = vperm.xlu1 %1584, %v1948_v7  }
 0x292   : > { %812 = vxpose.xlu1.c.b16.start.end [1/1] (short) (narrow) %v1874_v21, 16 }
 0x293   : > { %747 = vxpose.xlu0.c.b16.start.end [1/1] (short) (narrow) %v745_v25, 16 }
 0x297   : > { %986 = vxpose.xlu0.c.b16.start.end [1/1] (short) (narrow) %v984_v26, 16 }
 0x2e3   : > { %v617_v27 = vpop.xlane.xlu1 %616 }
 0x2e4   : > { %1620 = vrcp.f32 %v617_v27 }
 0x2e7   : > { %v726_v29 = vpop.xlane.xlu1 %725 }
 0x2e8   : > { %1622 = vrcp.f32 %v726_v29 }
 0x2eb   : > { %v623_v34 = vpop.permute.xlu1 %622 }
 0x2ef   : > { %v966_v31 = vpop.xlane.xlu0 %965 }
 0x2f0   : > { %1624 = vrcp.f32 %v966_v31 }
 0x2f1   : > { %v1621_v32 = vpop.eup %1620 }
 0x2f2   : > { %v619_v33 = vmul.f32 %v1621_v32, %v1615_v18 }
 0x2f4   : > { %v625_v35 = vmul.f32 %v623_v34, %v619_v33  ;;  %v820_v2 = vpop.trf.xlu1  ;;  %v1391_v34 = vld [vmem:[%s2072_s6 + $0x3] ss:$0 sm:$0xff] }
 0x2f5   : > { %v1623_v36 = vpop.eup %1622  ;;  %v755_v53 = vpop.trf.xlu0 }
 0x2f6   : > { %v626_v37 = vsel %vm608_vm3, %v625_v35, 0.0  ;;  %v728_v38 = vmul.f32 %v1623_v36, %v1617_v20  ;;  %v634_v47 = vpack.c.bf16 %v625_v35, %v625_v35 }
 0x2f7   : > { %v627_v39 = vrot.slane %v626_v37, 4 }
 0x2f8   : > { %v733_v40 = vmul.f32 %v731_v28, %v728_v38  ;;  %v832_v56 = vsel %vm767_vm4, %v634_v47, 0 }
 0x2f9   : > { %v628_v42 = vadd.f32 %v627_v39, %v626_v37  ;;  %v994_v11 = vpop.trf.xlu0 }
 0x2fa   : > { %v734_v43 = vsel %vm608_vm3, %v733_v40, 0.0  ;;  %v742_v44 = vpack.c.bf16 %v733_v40, %v733_v40 }
 0x2fb   : > { %v629_v45 = vrot.slane %v628_v42, 2  ;;  %v735_v46 = vrot.slane %v734_v43, 4 }
 0x2fc   : > { %v769_v48 = vsel %vm767_vm4, %v742_v44, 0  ;;  %v1702_v44 = vmov 3  }
 0x2fd   : > { %v1625_v50 = vpop.eup %1624  ;;  %v630_v51 = vadd.f32 %v629_v45, %v628_v42  ;;  %v736_v52 = vadd.f32 %v735_v46, %v734_v43  ;;  %1485 = vmatpush3.bf16.msra.mxu0 %v769_v48  ;;  %1586 = vset.pattern.permute.xlu1 %v1702_v44 }
 0x2fe   : > { %1490 = vmatprep.subr.bf16.mxu0 %v1694_v1  ;;  %v968_v54 = vmul.f32 %v1625_v50, %v1619_v23  ;;  %1587 = vset.pattern.permute.xlu0 %v1702_v44 }
 0x2ff   : > { %v737_v55 = vrot.slane %v736_v52, 2  ;;  %v631_v58 = vrot.slane %v630_v51, 1 }
 0x300   : > { %1487 = vmatmul.mubr.msk.bf16.vlgmr.msra.gmra.mxu0 %vm763_vm5, %v755_v53  ;;  %v973_v57 = vmul.f32 %v971_v30, %v968_v54 }
 0x301   : > { %v738_v59 = vadd.f32 %v737_v55, %v736_v52  ;;  %1491 = vmatpush3.bf16.msra.mxu0 %v832_v56  ;;  %1492 = vmatprep.mubr.msk.bf16.mxu0 %vm1695_vm0, %v1694_v1  ;;  %v632_v0 = vadd.f32 %v631_v58, %v630_v51 }
 0x302   : > { %1508 = vmatprep.subr.bf16.mxu0 %v1694_v1  ;;  %v974_v60 = vsel %vm608_vm3, %v973_v57, 0.0  ;;  %v982_v63 = vpack.c.bf16 %v973_v57, %v973_v57 }
 0x303   : > { %v975_v61 = vrot.slane %v974_v60, 4  ;;  %v739_v62 = vrot.slane %v738_v59, 1 }
 0x304   : > { %v1006_v8 = vsel %vm767_vm4, %v982_v63, 0 }
 0x305   : > { %v976_v3 = vadd.f32 %v975_v61, %v974_v60  ;;  %v740_v4 = vadd.f32 %v739_v62, %v738_v59 }
 0x307   : > { %v977_v5 = vrot.slane %v976_v3, 2  ;;  %v741_v6 = vadd.f32 %v740_v4, %v632_v0  ;;  %v1227_v0 = vld [vmem:[%s2075_s9] sm:$0xff] }
 0x308   : > { %1493 = vmatmul.mubr.msk.bf16.vlgmr.msra.gmra.mxu0 %vm763_vm5, %v820_v2 }
 0x309   : > { %1509 = vmatpush3.bf16.msra.mxu0 %v1006_v8  ;;  %1510 = vmatprep.mubr.msk.bf16.mxu0 %vm1695_vm0, %v1694_v1  ;;  %v978_v9 = vadd.f32 %v977_v5, %v976_v3 }
 0x30a   : > { %1514 = vmatprep.subr.bf16.mxu0 %v1694_v1 }
 0x30b   : > { %v979_v10 = vrot.slane %v978_v9, 1 }
 0x30d   : > { %v980_v13 = vadd.f32 %v979_v10, %v978_v9 }
 0x30f   : > { %v1975_v14 = vadd.f32 %v980_v13, %v741_v6  ;;  %v1228_v6 = vld [vmem:[%s2075_s9 + $0x8] sm:$0xff] }
 0x310   : > { %1511 = vmatmul.mubr.msk.bf16.vlgmr.msra.gmra.mxu0 %vm763_vm5, %v994_v11 }
 0x311   : > { %1515 = vmatpush3.bf16.msra.mxu0 %v1606_v12  ;;  %1522 = vmatprep.mubr.msk.bf16.mxu0 %vm1695_vm0, %v1694_v1 }
 0x312   : > { %1516 = vmatprep.subr.bf16.mxu0 %v1694_v1 }
 0x315   : > { %1517 = vmatpush3.bf16.msra.mxu0 %v1607_v15 }
 0x316   : > { %1518 = vmatprep.subr.bf16.mxu0 %v1694_v1 }
 0x319   : > { %1519 = vmatpush3.bf16.msra.mxu0 %v1608_v16 }
 0x31a   : > { %1520 = vmatprep.subr.bf16.mxu0 %v1694_v1 }
 0x31d   : > { %1521 = vmatpush3.bf16.msra.mxu0 %v1609_v17 }
 0x320   : > { %1523 = vmatmul.mubr.msk.bf16.vlgmr.msra.gmra.mxu0 %vm465_vm2, %v1874_v21 }
 0x3c0   : > { %v805_v18 = vpop.f32.mrf.mxu0 }
 0x3c2   : > { %v1488_v19 = vpop.f32.mrf.mxu0 }
 0x3c4   : > { %v808_v20 = vpop.f32.mrf.mxu0 }
 0x3c6   : > { %v1489_v22 = vpop.f32.mrf.mxu0 }
 0x3c8   : > { %v868_v23 = vpop.f32.mrf.mxu0 }
 0x3c9   : > { %v869_v24 = vadd.f32 %v868_v23, %v805_v18 }
 0x3ca   : > { %v1494_v25 = vpop.f32.mrf.mxu0 }
 0x3cc   : > { %v871_v26 = vpop.f32.mrf.mxu0 }
 0x3cd   : > { %v872_v27 = vadd.f32 %v871_v26, %v808_v20 }
 0x3ce   : > { %v1495_v28 = vpop.f32.mrf.mxu0 }
 0x3d0   : > { %v1042_v29 = vpop.f32.mrf.mxu0 }
 0x3d1   : > { %v1049_v30 = vadd.f32 %v1042_v29, %v869_v24 }
 0x3d2   : > { %v1512_v31 = vpop.f32.mrf.mxu0 }
 0x3d4   : > { %v1045_v32 = vpop.f32.mrf.mxu0 }
 0x3d5   : > { %v1050_v33 = vadd.f32 %v1045_v32, %v872_v27 }
 0x3d6   : > { %v1513_v1 = vpop.f32.mrf.mxu0 }
 0x3e0   : > { %v1126_v35 = vpop.f32.mrf.mxu0 }
 0x3e1   : > { %v1127_v36 = vadd.f32 %v1391_v34, %v1126_v35 }
 0x3e2   : > { %v1524_v37 = vpop.f32.mrf.mxu0 }
 0x3e3   : > { %v1132_v38 = vmul.f32 %v1127_v36, %v1924_v41 }
 0x3e4   : > { %v1129_v39 = vpop.f32.mrf.mxu0 }
 0x3e5   : > { %v1133_v40 = vadd.f32 %v1132_v38, %v1931_v49 }
 0x3e6   : > { %v1525_v42 = vpop.f32.mrf.mxu0 }
 0x3e7   : > { %v1134_v43 = vsel %vm608_vm3, %v1133_v40, -inf }
 0x3e8   : > { %1135 = vmax.xlane.f32.xlu0 %v1134_v43 }
 0x3fe   : > { %1159 = vrot.lane.b32.xlu0 %v1874_v21, %s1701_s26 }
 0x471   : > { %v1136_v45 = vpop.xlane.xlu0 %1135 }
 0x472   : > { %v1137_v46 = vsub.f32 %v1133_v40, %v1136_v45 }
 0x474   : > { %v1138_v47 = vmul.f32 1.442695, %v1137_v46 }
 0x475   : > { %v1160_v49 = vpop.permute.xlu0 %1159 }
 0x476   : > { %1626 = vpow2.f32 %v1138_v47 }
 0x483   : > { %v1627_v48 = vpop.eup %1626 }
 0x484   : > { %v1140_v41 = vsel %vm608_vm3, %v1627_v48, 0.0 }
 0x485   : > { %1141 = vadd.xlane.f32.xlu1 %v1140_v41 }
 0x496   : > { %1146 = vperm.xlu1 %1586, %v1948_v7  }
 0x4b9   : > { %1162 = vxpose.xlu1.c.b16.start.end [1/1] (short) (narrow) %v1160_v49, 16 }
 0x50e   : > { %v1142_v50 = vpop.xlane.xlu1 %1141 }
 0x50f   : > { %1628 = vrcp.f32 %v1142_v50 }
 0x512   : > { %v1147_v21 = vpop.permute.xlu1 %1146 }
 0x51b   : > { %v1170_v59 = vpop.trf.xlu1 }
 0x51c   : > { %v1629_v51 = vpop.eup %1628 }
 0x51d   : > { %v1144_v52 = vmul.f32 %v1629_v51, %v1627_v48 }
 0x51f   : > { %v1149_v53 = vmul.f32 %v1147_v21, %v1144_v52 }
 0x521   : > { %v1150_v54 = vsel %vm608_vm3, %v1149_v53, 0.0  ;;  %v1158_v55 = vpack.c.bf16 %v1149_v53, %v1149_v53 }
 0x522   : > { %v1151_v56 = vrot.slane %v1150_v54, 4 }
 0x523   : > { %v1182_v57 = vsel %vm767_vm4, %v1158_v55, 0 }
 0x524   : > { %v1152_v58 = vadd.f32 %v1151_v56, %v1150_v54  ;;  %1527 = vmatpush3.bf16.msra.mxu1 %v1182_v57 }
 0x526   : > { %v1153_v60 = vrot.slane %v1152_v58, 2 }
 0x527   : > { %1529 = vmatmul.mubr.msk.bf16.vlgmr.msra.gmra.mxu1 %vm763_vm5, %v1170_v59 }
 0x528   : > { %v1154_v7 = vadd.f32 %v1153_v60, %v1152_v58 }
 0x52a   : > { %v1155_v61 = vrot.slane %v1154_v7, 1 }
 0x52c   : > { %v1156_v62 = vadd.f32 %v1155_v61, %v1154_v7 }
 0x52e   : > { %v1157_v63 = vadd.f32 %v1156_v62, %v1975_v14 }
 0x530   : > { %v1229_v4 = vmul.f32 %v1227_v0, %v1157_v63  ;;  %v1230_v11 = vmul.f32 %v1228_v6, %v1157_v63 }
 0x5e7   : > { %v1218_v2 = vpop.f32.mrf.mxu1 }
 0x5e8   : > { %v1225_v3 = vadd.f32 %v1218_v2, %v1049_v30 }
 0x5e9   : > { %v1530_v5 = vpop.f32.mrf.mxu1 }
 0x5ea   : > { %v1231_v8 = vsub.f32 %v1225_v3, %v1229_v4 }
 0x5eb   : > { %v1221_v9 = vpop.f32.mrf.mxu1 }
 0x5ec   : > { %v1226_v10 = vadd.f32 %v1221_v9, %v1050_v33  ;;  %v1233_v13 = vmul.f32 %v1231_v8, %v1231_v8 }
 0x5ed   : > { %v1531_v12 = vpop.f32.mrf.mxu1 }
 0x5ee   : > { %v1232_v14 = vsub.f32 %v1226_v10, %v1230_v11  ;;  %v1235_v16 = vsel %vm608_vm3, %v1233_v13, 0.0 }
 0x5f0   : > { %v1234_v15 = vmul.f32 %v1232_v14, %v1232_v14 }
 0x5f2   : > { %v1236_v17 = vsel %vm608_vm3, %v1234_v15, 0.0 }
 0x5f3   : > { %v1237_v18 = vadd.f32 %v1236_v17, %v1235_v16 }
 0x5f5   : > { %v1238_v19 = vrot.slane %v1237_v18, 4 }
 0x5f7   : > { %v1239_v20 = vadd.f32 %v1238_v19, %v1237_v18 }
 0x5f9   : > { %v1240_v22 = vrot.slane %v1239_v20, 2 }
 0x5fb   : > { %v1241_v23 = vadd.f32 %v1240_v22, %v1239_v20 }
 0x5fd   : > { %v1242_v24 = vrot.slane %v1241_v23, 1 }
 0x5ff   : > { %v1243_v25 = vadd.f32 %v1242_v24, %v1241_v23 }
 0x601   : > { %v1244_v26 = vmax.f32 %v1243_v25, 1e-24 }
 0x603   : > { %1630 = vrsqrt.f32 %v1244_v26 }
 0x610   : > { %v1631_v27 = vpop.eup %1630 }
 0x611   : > { %v1247_v28 = vmul.f32 %v1631_v27, %v1232_v14  ;;  %v1246_v29 = vmul.f32 %v1631_v27, %v1231_v8 }
 0x613   : > { %1249 = vst.msk [vmem:[%s350_s20 + $0x8] sm:$0xff] %vm608_vm3, %v1247_v28  ;;  %1248 = vst.msk [vmem:[%s350_s20] sm:$0xff] %vm608_vm3, %v1246_v29 }
 0x614   : > { %1645 = shalt.err (!%p1642_p3)
}
 0x615   : > { %s1646_s11 = scalar_lea.hbm %s2020_s27, 256  ;;  %s1650_s25 = scalar_lea.hbm %s2076_s10, 512 }
 0x616   : > { %p1647_p4 = scmp.ne.s32.totalorder %s2020_s27, %s1646_s11  ;;  %p1651_p9 = scmp.lt.s32.totalorder %s2020_s27, %s2076_s10 }
 0x617   : > { %p1652_p10 = scmp.lt.s32.totalorder %s1650_s25, %s1646_s11 }
 0x618   : > { %p1648_p7 = pnand %p1647_p4, %p1799_p5 }
 0x619   : > { %p1653_p11 = por %p1652_p10, %p1651_p9 }
 0x61a   : > { %p1649_p8 = pneg %p1648_p7 }
 0x61c   : > { %p1654_p12 = pnand %p1653_p11, %p1649_p8 }
 0x61e   : > { %1657 = shalt.err (!%p1654_p12)
}
 0x61f   : > { %s1704_s28 = smov 128   ;;  %s1705_s30 = smov 8  }
 0x620   : > { %1532 = dma.vmem_to_hbm [thread:$0]  (%p1799_p5), %s2022_s21, 256, %s2020_s27, %s2026_s17, %s1704_s28, %s1704_s28, %s1705_s30  }
 0x621 PF: > { %p1538_p13 = scmp.ge.s32.totalorder %s1692_s16, 2  ;;  %s1279_s12 = sand.u32 1, %s1680_s13  }
 0x622   : > { %s1280_s11 = scalar_lea.sflag [#allocation3], %s1279_s12 }
 0x623   : > { %p1535_p0 = pnand %p1538_p13, %p1803_p6 }
 0x625   : > { %p1536_p1 = pneg %p1535_p0 }
 0x627   : > { %1675 = dma.done.wait (%p1536_p1), %s1280_s11, 256  }
 0x628   : > { %1677 = vsyncadd (%p1536_p1), %s1280_s11, 4294967040  ;;  %p20_p2 = scmp.ge.s32.totalorder %s1786_s19, 4   ;;  %s2079_s13 = smov %s1684_s14 }
 0x629   : > { %s2080_s14 = smov %s1688_s15  ;;  %s2081_s15 = smov %s1797_s22 }
 0x62a   : > { %s2082_s16 = smov %s1786_s19  ;;  %22 = sbr.rel (!%p20_p2) target bundleno = 3 (0x3), region = 101 }
 0x62f   :  { %1285 = vsyncpa [#allocation3], 1 }
 0x630   :  { %1287 = vsyncpa [#allocation3 + $0x1], 1 }

</bundles_post_ra>
